<compile_context>
chip_gen: v7x
topology: tpu7x:2x2x1
jax: 0.10.0
libtpu: 0.0.40
codegen_flags: <defaults>
</compile_context>

<pallas_src>
import functools

import jax
import jax.numpy as jnp
from jax.experimental import pallas as pl
from jax.experimental.pallas import tpu as pltpu

LEAKY_SLOPE = 0.01   # nn.LeakyReLU default
LN_EPS = 1e-5        # nn.LayerNorm default


def _round_up(n, m):
    return ((n + m - 1) // m) * m


def _leaky_relu(h):
    # slope < 1  =>  max(h, slope*h) == LeakyReLU(h); one mul + one max.
    return jnp.maximum(h, LEAKY_SLOPE * h)


def _layer_norm_padded(h, gamma, beta, n_true):
    # h's padded lanes are zero, so lane-sums over the full (padded) width
    # equal the true sums; divide by the true feature count.
    inv_n = 1.0 / n_true
    s = jnp.sum(h, axis=-1, keepdims=True)
    ss = jnp.sum(h * h, axis=-1, keepdims=True)
    mu = s * inv_n
    var = jnp.maximum(ss * inv_n - mu * mu, 0.0)
    # gamma/beta are zero in padded lanes, so padded lanes stay exactly zero.
    return (h - mu) * jax.lax.rsqrt(var + LN_EPS) * gamma + beta


def mean_q_kernel(x_ref, w1_ref, w2_ref, wq_ref, vec_ref, out_ref,
                  *, h_true, op_pad):
    # packed vectors: rows 0..5 = b1,g1,be1,b2,g2,be2 (Hp wide), row 6 = bq
    b1 = vec_ref[0:1, :]
    g1 = vec_ref[1:2, :]
    be1 = vec_ref[2:3, :]
    b2 = vec_ref[3:4, :]
    g2 = vec_ref[4:5, :]
    be2 = vec_ref[5:6, :]
    bq = vec_ref[6:7, :op_pad]

    x = x_ref[...].astype(jnp.bfloat16)

    # linear1 (bf16 x bf16 -> f32) + LeakyReLU + LayerNorm (f32)
    h = jnp.dot(x, w1_ref[...], preferred_element_type=jnp.float32) + b1
    h = _leaky_relu(h)
    h = _layer_norm_padded(h, g1, be1, h_true)

    # linear2 + LeakyReLU + LayerNorm
    h = jnp.dot(h.astype(jnp.bfloat16), w2_ref[...],
                preferred_element_type=jnp.float32) + b2
    h = _leaky_relu(h)
    h = _layer_norm_padded(h, g2, be2, h_true)

    # q head (lane-dense padded output, stored bf16)
    q = jnp.dot(h.astype(jnp.bfloat16), wq_ref[...],
                preferred_element_type=jnp.float32) + bq
    out_ref[...] = q.astype(out_ref.dtype)


def init_params(key, ip_dim, op_dim, num_edges):
    """Deterministic synthetic parameters matching mean_q.__init__ shapes
    (weights stored [in, out], i.e. transposed vs. PyTorch)."""
    HIDDEN_DIM_1 = 100
    hDim_1 = num_edges * HIDDEN_DIM_1
    ks = jax.random.split(key, 6)

    def uinit(k, shape, fan_in):
        bound = 1.0 / jnp.sqrt(fan_in)
        return jax.random.uniform(k, shape, jnp.float32, -bound, bound)

    params = {
        "w1": uinit(ks[0], (ip_dim, hDim_1), ip_dim),
        "b1": uinit(ks[1], (1, hDim_1), ip_dim),
        "g1": jnp.ones((1, hDim_1), jnp.float32),
        "be1": jnp.zeros((1, hDim_1), jnp.float32),
        "w2": uinit(ks[2], (hDim_1, hDim_1), hDim_1),
        "b2": uinit(ks[3], (1, hDim_1), hDim_1),
        "g2": jnp.ones((1, hDim_1), jnp.float32),
        "be2": jnp.zeros((1, hDim_1), jnp.float32),
        "wq": uinit(ks[4], (hDim_1, op_dim), hDim_1),
        "bq": uinit(ks[5], (1, op_dim), hDim_1),
    }
    return params


def pad_params(params):
    """Pad hidden/out dims to lane-friendly multiples of 128, cast weight
    matrices to bf16, and pack all 1-D parameter vectors into one (8, Hp)
    f32 array.  Padded weight rows/cols, biases, gamma and beta are zero, so
    padded lanes never affect the result."""
    iDim, H = params["w1"].shape
    O = params["wq"].shape[1]
    Hp = max(_round_up(H, 128), 128)
    Op = max(_round_up(O, 128), 128)
    assert Op <= Hp, "q-head output wider than hidden not supported by packing"

    def padto(a, rows, cols):
        out = jnp.zeros((rows, cols), a.dtype)
        return out.at[: a.shape[0], : a.shape[1]].set(a)

    vecs = jnp.zeros((8, Hp), jnp.float32)
    vecs = vecs.at[0, :H].set(params["b1"][0])
    vecs = vecs.at[1, :H].set(params["g1"][0])
    vecs = vecs.at[2, :H].set(params["be1"][0])
    vecs = vecs.at[3, :H].set(params["b2"][0])
    vecs = vecs.at[4, :H].set(params["g2"][0])
    vecs = vecs.at[5, :H].set(params["be2"][0])
    vecs = vecs.at[6, :O].set(params["bq"][0])

    padded = {
        "w1": padto(params["w1"], iDim, Hp).astype(jnp.bfloat16),
        "w2": padto(params["w2"], Hp, Hp).astype(jnp.bfloat16),
        "wq": padto(params["wq"], Hp, Op).astype(jnp.bfloat16),
        "vecs": vecs,
    }
    meta = {"h_true": H, "op_dim": O, "idim": iDim, "hp": Hp, "op": Op}
    return padded, meta


def _pick_tile(B, batch_tile):
    """Batch tile: big enough to amortize per-step overhead, but capped at
    ~B/2 (rounded to 8 sublanes) so the grid has >=2 steps when the batch
    permits -> both v7x TensorCores get work."""
    if B >= 16:
        half = _round_up((B + 1) // 2, 8)
        return max(8, min(batch_tile, half))
    return _round_up(max(B, 1), 8)


def mean_q_forward(x, padded_params, meta, *, batch_tile=1024):
    """Run the fused mean_q MLP. x: [B, iDim] float32. Returns [B, op_dim] f32."""
    x = jnp.asarray(x, jnp.float32)
    B, iDim = x.shape
    assert iDim == meta["idim"]
    Hp, Op = meta["hp"], meta["op"]
    H_true = meta["h_true"]

    tile = _pick_tile(B, batch_tile)
    Bp = _round_up(B, tile)
    if Bp != B:
        x = jnp.pad(x, ((0, Bp - B), (0, 0)))

    grid = (Bp // tile,)

    def rep(shape):
        # Whole-array (replicated) block for parameters; constant block index
        # suppresses re-DMA across grid steps.
        return pl.BlockSpec(shape, lambda i: (0, 0))

    in_specs = [
        pl.BlockSpec((tile, iDim), lambda i: (i, 0)),  # x tile (f32, cast in-kernel)
        rep((iDim, Hp)),                               # w1
        rep((Hp, Hp)),                                 # w2
        rep((Hp, Op)),                                 # wq
        rep((8, Hp)),                                  # packed b/gamma/beta/bq
    ]
    out_specs = pl.BlockSpec((tile, Op), lambda i: (i, 0))

    flops = 2 * Bp * (iDim * Hp + Hp * Hp + Hp * Op)
    param_bytes = sum(int(v.size) * v.dtype.itemsize for v in padded_params.values())
    bytes_accessed = Bp * iDim * 4 + Bp * Op * 2 + param_bytes
    cost = pl.CostEstimate(flops=flops, transcendentals=2 * Bp,
                           bytes_accessed=bytes_accessed)

    kernel = functools.partial(mean_q_kernel, h_true=float(H_true), op_pad=Op)

    out = pl.pallas_call(
        kernel,
        out_shape=jax.ShapeDtypeStruct((Bp, Op), jnp.bfloat16),
        grid_spec=pltpu.PrefetchScalarGridSpec(
            num_scalar_prefetch=0,
            grid=grid,
            in_specs=in_specs,
            out_specs=out_specs,
        ),
        compiler_params=pltpu.CompilerParams(
            dimension_semantics=("parallel",),
            vmem_limit_bytes=32 * 1024 * 1024,
        ),
        cost_estimate=cost,
    )(x,
      padded_params["w1"], padded_params["w2"], padded_params["wq"],
      padded_params["vecs"])

    # Slice off padded rows / lanes and restore the module's f32 output dtype
    # (tiny [B, op_dim] tensor, negligible cost).
    return out[:B, : meta["op_dim"]].astype(jnp.float32)


def mean_q_reference(x, params):
    """Plain-JAX reference mirroring the kernel's bf16 matmul operands
    (f32 accumulation, f32 LeakyReLU/LayerNorm), on the unpadded shapes."""
    def q16(a):
        return a.astype(jnp.bfloat16).astype(jnp.float32)

    def ln(h, gamma, beta):
        mu = jnp.mean(h, axis=-1, keepdims=True)
        var = jnp.mean((h - mu) ** 2, axis=-1, keepdims=True)
        return (h - mu) * jax.lax.rsqrt(var + LN_EPS) * gamma + beta

    h = q16(x) @ q16(params["w1"]) + params["b1"]
    h = _leaky_relu(h)
    h = ln(h, params["g1"], params["be1"])
    h = q16(h) @ q16(params["w2"]) + params["b2"]
    h = _leaky_relu(h)
    h = ln(h, params["g2"], params["be2"])
    return q16(h) @ q16(params["wq"]) + params["bq"]


if __name__ == "__main__":
    key = jax.random.PRNGKey(0)
    kx, kp = jax.random.split(key)

    # Small shapes consistent with the module: mean_q(ip_dim=32, op_dim=8, num_edges=2)
    ip_dim, op_dim, num_edges = 32, 8, 2
    batch = 8

    params = init_params(kp, ip_dim, op_dim, num_edges)
    padded_params, meta = pad_params(params)
    x = jax.random.normal(kx, (batch, ip_dim), jnp.float32)

    q = mean_q_forward(x, padded_params, meta)
    q = jax.block_until_ready(q)

    q_ref = mean_q_reference(x, params)
    assert q.shape == (batch, op_dim)
    assert bool(jnp.all(jnp.isfinite(q)))
    # kernel stores the q head in bf16, so allow bf16-level tolerance
    assert jnp.allclose(q, q_ref, atol=2e-2, rtol=2e-2)

    print("KERNEL_OK")
</pallas_src>

<mosaic_0001>
module attributes {stable_mosaic.version = 11 : i64} {
  func.func @mean_q_kernel(%arg0: i32, %arg1: memref<8x32xf32, #tpu.memory_space<vmem>>, %arg2: memref<32x256xbf16, #tpu.memory_space<vmem>>, %arg3: memref<256x256xbf16, #tpu.memory_space<vmem>>, %arg4: memref<256x128xbf16, #tpu.memory_space<vmem>>, %arg5: memref<8x256xf32, #tpu.memory_space<vmem>>, %arg6: memref<8x128xbf16, #tpu.memory_space<vmem>>) attributes {dimension_semantics = [#tpu.dimension_semantics<parallel>], iteration_bounds = array<i64: 1>, scalar_prefetch = 0 : i64, scratch_operands = 0 : i64, tpu.core_type = #tpu.core_type<tc>, window_params = [{transform_indices = @transform_0, window_bounds = array<i64: 8, 32>}, {pipeline_mode = #tpu.pipeline_mode<synchronous>, transform_indices = @transform_1, window_bounds = array<i64: 32, 256>}, {pipeline_mode = #tpu.pipeline_mode<synchronous>, transform_indices = @transform_2, window_bounds = array<i64: 256, 256>}, {pipeline_mode = #tpu.pipeline_mode<synchronous>, transform_indices = @transform_3, window_bounds = array<i64: 256, 128>}, {pipeline_mode = #tpu.pipeline_mode<synchronous>, transform_indices = @transform_4, window_bounds = array<i64: 8, 256>}, {transform_indices = @transform_5, window_bounds = array<i64: 8, 128>}]} {
    %c0 = arith.constant 0 : index
    %c0_0 = arith.constant 0 : index
    %0 = vector.load %arg5[%c0, %c0_0] : memref<8x256xf32, #tpu.memory_space<vmem>>, vector<1x256xf32>
    %c1 = arith.constant 1 : index
    %c0_1 = arith.constant 0 : index
    %1 = vector.load %arg5[%c1, %c0_1] : memref<8x256xf32, #tpu.memory_space<vmem>>, vector<1x256xf32>
    %c2 = arith.constant 2 : index
    %c0_2 = arith.constant 0 : index
    %2 = vector.load %arg5[%c2, %c0_2] : memref<8x256xf32, #tpu.memory_space<vmem>>, vector<1x256xf32>
    %c3 = arith.constant 3 : index
    %c0_3 = arith.constant 0 : index
    %3 = vector.load %arg5[%c3, %c0_3] : memref<8x256xf32, #tpu.memory_space<vmem>>, vector<1x256xf32>
    %c4 = arith.constant 4 : index
    %c0_4 = arith.constant 0 : index
    %4 = vector.load %arg5[%c4, %c0_4] : memref<8x256xf32, #tpu.memory_space<vmem>>, vector<1x256xf32>
    %c5 = arith.constant 5 : index
    %c0_5 = arith.constant 0 : index
    %5 = vector.load %arg5[%c5, %c0_5] : memref<8x256xf32, #tpu.memory_space<vmem>>, vector<1x256xf32>
    %c6 = arith.constant 6 : index
    %c0_6 = arith.constant 0 : index
    %6 = vector.load %arg5[%c6, %c0_6] : memref<8x256xf32, #tpu.memory_space<vmem>>, vector<1x128xf32>
    %c0_7 = arith.constant 0 : index
    %c0_8 = arith.constant 0 : index
    %7 = vector.load %arg1[%c0_7, %c0_8] : memref<8x32xf32, #tpu.memory_space<vmem>>, vector<8x32xf32>
    %8 = arith.truncf %7 : vector<8x32xf32> to vector<8x32xbf16>
    %c0_9 = arith.constant 0 : index
    %c0_10 = arith.constant 0 : index
    %9 = vector.load %arg2[%c0_9, %c0_10] : memref<32x256xbf16, #tpu.memory_space<vmem>>, vector<32x256xbf16>
    %cst = arith.constant dense<0.000000e+00> : vector<8x256xf32>
    %10 = tpu.matmul %8, %9, %cst {dimension_numbers = #tpu.dot_dimension_numbers<[1], [0], [0], [1], [0, 0, 1, 1], [], []>} : vector<8x32xbf16>, vector<32x256xbf16>, vector<8x256xf32> -> vector<8x256xf32>
    %11 = vector.broadcast %0 : vector<1x256xf32> to vector<8x256xf32>
    %12 = arith.addf %10, %11 : vector<8x256xf32>
    %cst_11 = arith.constant 0.00999999977 : f32
    %13 = vector.broadcast %cst_11 : f32 to vector<8x256xf32>
    %14 = arith.mulf %13, %12 : vector<8x256xf32>
    %15 = arith.maximumf %12, %14 : vector<8x256xf32>
    %cst_12 = arith.constant dense<0.000000e+00> : vector<8xf32>
    %16 = vector.multi_reduction <add>, %15, %cst_12 [1] : vector<8x256xf32> to vector<8xf32>
    %17 = vector.shape_cast %16 : vector<8xf32> to vector<8x1xf32>
    %18 = arith.mulf %15, %15 : vector<8x256xf32>
    %cst_13 = arith.constant dense<0.000000e+00> : vector<8xf32>
    %19 = vector.multi_reduction <add>, %18, %cst_13 [1] : vector<8x256xf32> to vector<8xf32>
    %20 = vector.shape_cast %19 : vector<8xf32> to vector<8x1xf32>
    %cst_14 = arith.constant 5.000000e-03 : f32
    %21 = vector.broadcast %cst_14 : f32 to vector<8x1xf32>
    %22 = arith.mulf %17, %21 : vector<8x1xf32>
    %cst_15 = arith.constant 5.000000e-03 : f32
    %23 = vector.broadcast %cst_15 : f32 to vector<8x1xf32>
    %24 = arith.mulf %20, %23 : vector<8x1xf32>
    %25 = arith.mulf %22, %22 : vector<8x1xf32>
    %26 = arith.subf %24, %25 : vector<8x1xf32>
    %cst_16 = arith.constant 0.000000e+00 : f32
    %27 = vector.broadcast %cst_16 : f32 to vector<8x1xf32>
    %28 = arith.maximumf %26, %27 : vector<8x1xf32>
    %29 = vector.broadcast %22 : vector<8x1xf32> to vector<8x256xf32>
    %30 = arith.subf %15, %29 : vector<8x256xf32>
    %cst_17 = arith.constant 9.99999974E-6 : f32
    %31 = vector.broadcast %cst_17 : f32 to vector<8x1xf32>
    %32 = arith.addf %28, %31 : vector<8x1xf32>
    %33 = math.rsqrt %32 : vector<8x1xf32>
    %34 = vector.broadcast %33 : vector<8x1xf32> to vector<8x256xf32>
    %35 = arith.mulf %30, %34 : vector<8x256xf32>
    %36 = vector.broadcast %1 : vector<1x256xf32> to vector<8x256xf32>
    %37 = arith.mulf %35, %36 : vector<8x256xf32>
    %38 = vector.broadcast %2 : vector<1x256xf32> to vector<8x256xf32>
    %39 = arith.addf %37, %38 : vector<8x256xf32>
    %40 = arith.truncf %39 : vector<8x256xf32> to vector<8x256xbf16>
    %c0_18 = arith.constant 0 : index
    %c0_19 = arith.constant 0 : index
    %41 = vector.load %arg3[%c0_18, %c0_19] : memref<256x256xbf16, #tpu.memory_space<vmem>>, vector<256x256xbf16>
    %cst_20 = arith.constant dense<0.000000e+00> : vector<8x256xf32>
    %42 = tpu.matmul %40, %41, %cst_20 {dimension_numbers = #tpu.dot_dimension_numbers<[1], [0], [0], [1], [0, 0, 1, 1], [], []>} : vector<8x256xbf16>, vector<256x256xbf16>, vector<8x256xf32> -> vector<8x256xf32>
    %43 = vector.broadcast %3 : vector<1x256xf32> to vector<8x256xf32>
    %44 = arith.addf %42, %43 : vector<8x256xf32>
    %cst_21 = arith.constant 0.00999999977 : f32
    %45 = vector.broadcast %cst_21 : f32 to vector<8x256xf32>
    %46 = arith.mulf %45, %44 : vector<8x256xf32>
    %47 = arith.maximumf %44, %46 : vector<8x256xf32>
    %cst_22 = arith.constant dense<0.000000e+00> : vector<8xf32>
    %48 = vector.multi_reduction <add>, %47, %cst_22 [1] : vector<8x256xf32> to vector<8xf32>
    %49 = vector.shape_cast %48 : vector<8xf32> to vector<8x1xf32>
    %50 = arith.mulf %47, %47 : vector<8x256xf32>
    %cst_23 = arith.constant dense<0.000000e+00> : vector<8xf32>
    %51 = vector.multi_reduction <add>, %50, %cst_23 [1] : vector<8x256xf32> to vector<8xf32>
    %52 = vector.shape_cast %51 : vector<8xf32> to vector<8x1xf32>
    %cst_24 = arith.constant 5.000000e-03 : f32
    %53 = vector.broadcast %cst_24 : f32 to vector<8x1xf32>
    %54 = arith.mulf %49, %53 : vector<8x1xf32>
    %cst_25 = arith.constant 5.000000e-03 : f32
    %55 = vector.broadcast %cst_25 : f32 to vector<8x1xf32>
    %56 = arith.mulf %52, %55 : vector<8x1xf32>
    %57 = arith.mulf %54, %54 : vector<8x1xf32>
    %58 = arith.subf %56, %57 : vector<8x1xf32>
    %cst_26 = arith.constant 0.000000e+00 : f32
    %59 = vector.broadcast %cst_26 : f32 to vector<8x1xf32>
    %60 = arith.maximumf %58, %59 : vector<8x1xf32>
    %61 = vector.broadcast %54 : vector<8x1xf32> to vector<8x256xf32>
    %62 = arith.subf %47, %61 : vector<8x256xf32>
    %cst_27 = arith.constant 9.99999974E-6 : f32
    %63 = vector.broadcast %cst_27 : f32 to vector<8x1xf32>
    %64 = arith.addf %60, %63 : vector<8x1xf32>
    %65 = math.rsqrt %64 : vector<8x1xf32>
    %66 = vector.broadcast %65 : vector<8x1xf32> to vector<8x256xf32>
    %67 = arith.mulf %62, %66 : vector<8x256xf32>
    %68 = vector.broadcast %4 : vector<1x256xf32> to vector<8x256xf32>
    %69 = arith.mulf %67, %68 : vector<8x256xf32>
    %70 = vector.broadcast %5 : vector<1x256xf32> to vector<8x256xf32>
    %71 = arith.addf %69, %70 : vector<8x256xf32>
    %72 = arith.truncf %71 : vector<8x256xf32> to vector<8x256xbf16>
    %c0_28 = arith.constant 0 : index
    %c0_29 = arith.constant 0 : index
    %73 = vector.load %arg4[%c0_28, %c0_29] : memref<256x128xbf16, #tpu.memory_space<vmem>>, vector<256x128xbf16>
    %cst_30 = arith.constant dense<0.000000e+00> : vector<8x128xf32>
    %74 = tpu.matmul %72, %73, %cst_30 {dimension_numbers = #tpu.dot_dimension_numbers<[1], [0], [0], [1], [0, 0, 1, 1], [], []>} : vector<8x256xbf16>, vector<256x128xbf16>, vector<8x128xf32> -> vector<8x128xf32>
    %75 = vector.broadcast %6 : vector<1x128xf32> to vector<8x128xf32>
    %76 = arith.addf %74, %75 : vector<8x128xf32>
    %77 = arith.truncf %76 : vector<8x128xf32> to vector<8x128xbf16>
    %c0_31 = arith.constant 0 : index
    %c0_32 = arith.constant 0 : index
    %78 = vector.load %arg6[%c0_31, %c0_32] : memref<8x128xbf16, #tpu.memory_space<vmem>>, vector<8x128xbf16>
    tpu.vector_store %arg6[%c0_31, %c0_32], %77 {strides = array<i32>} : memref<8x128xbf16, #tpu.memory_space<vmem>>, vector<8x128xbf16>,
    return
  }
  func.func @transform_0(%arg0: i32) -> (i32, i32) {
    %c0_i32 = arith.constant 0 : i32
    %c0_i32_0 = arith.constant 0 : i32
    return %arg0, %c0_i32 : i32, i32
  }
  func.func @transform_1(%arg0: i32) -> (i32, i32) {
    %c0_i32 = arith.constant 0 : i32
    %c0_i32_0 = arith.constant 0 : i32
    %c0_i32_1 = arith.constant 0 : i32
    return %c0_i32, %c0_i32_0 : i32, i32
  }
  func.func @transform_2(%arg0: i32) -> (i32, i32) {
    %c0_i32 = arith.constant 0 : i32
    %c0_i32_0 = arith.constant 0 : i32
    %c0_i32_1 = arith.constant 0 : i32
    return %c0_i32, %c0_i32_0 : i32, i32
  }
  func.func @transform_3(%arg0: i32) -> (i32, i32) {
    %c0_i32 = arith.constant 0 : i32
    %c0_i32_0 = arith.constant 0 : i32
    %c0_i32_1 = arith.constant 0 : i32
    return %c0_i32, %c0_i32_0 : i32, i32
  }
  func.func @transform_4(%arg0: i32) -> (i32, i32) {
    %c0_i32 = arith.constant 0 : i32
    %c0_i32_0 = arith.constant 0 : i32
    %c0_i32_1 = arith.constant 0 : i32
    return %c0_i32, %c0_i32_0 : i32, i32
  }
  func.func @transform_5(%arg0: i32) -> (i32, i32) {
    %c0_i32 = arith.constant 0 : i32
    %c0_i32_0 = arith.constant 0 : i32
    return %arg0, %c0_i32 : i32, i32
  }
}

</mosaic_0001>

<bundles_post_ra>
// kernel: tpu_custom_call.1
= control target key start
LH: loop header
LB: loop body
LE: loop exit
PB: predicated region body
PF: predicated region fallthrough
CT: control target
= control target key end

     0   :  { %10 = vsyncpa [#allocation3], 0  ;;  %s1155_s0 = inlined_call_operand.hbm [shape: f32[8,32], index: 0, kind: input, shape index: {}]   ;;  %s1156_s1 = inlined_call_operand.hbm [shape: bf16[32,256], index: 1, kind: input, shape index: {}]   ;;  %s1157_s2 = inlined_call_operand.hbm [shape: bf16[256,256], index: 2, kind: input, shape index: {}]   ;;  %s1158_s3 = inlined_call_operand.hbm [shape: bf16[256,128], index: 3, kind: input, shape index: {}]   ;;  %s1159_s4 = inlined_call_operand.hbm [shape: f32[8,256], index: 4, kind: input, shape index: {}]   ;;  %s1160_s5 = inlined_call_operand.hbm [shape: bf16[8,128], index: 5, kind: output, shape index: {}]  }
   0x1   :  { %11 = vsyncpa [#allocation6], 0 }
   0x2   :  { %12 = vsyncpa [#allocation9], 0 }
   0x3   :  { %13 = vsyncpa [#allocation4], 0  ;;  %s1013_s18 = smov [#allocation5]   ;;  %s873_s22 = scalar_lea.hbm %s1156_s1, 512 }
   0x4   :  { %s29_s19 = sshll.u32 %s1013_s18, 4  ;;  %p874_p0 = scmp.ne.s32.totalorder %s1156_s1, %s873_s22  ;;  %s30_s19 = int_to_ptr.vmem [resolvable:$true] %s29_s19 }
   0x5   :  { %p877_p1 = scmp.lt.u32.totalorder %s873_s22, %s1156_s1 }
   0x7   :  { %p879_p2 = pnand %p877_p1, %p874_p0 }
   0x9   :  { %882 = shalt.err (!%p879_p2)
}
   0xa   :  { %s883_s27 = scalar_lea.vmem %s30_s19, 512  ;;  %p888_p4 = scmp.lt.s32.totalorder %s30_s19, %s30_s19 }
   0xb   :  { %p884_p3 = scmp.ne.s32.totalorder %s30_s19, %s883_s27  ;;  %p889_p5 = scmp.lt.s32.totalorder %s883_s27, %s883_s27 }
   0xd   :  { %p890_p6 = por %p889_p5, %p888_p4 }
   0xf   :  { %p891_p7 = pnand %p890_p6, %p884_p3 }
  0x11   :  { %894 = shalt.err (!%p891_p7)
}
  0x12   :  { %s1014_s28 = smov 128   ;;  %s1015_s29 = smov 8  }
  0x13   :  { %35 = dma.hbm_to_vmem [thread:$0]  %s1156_s1, 512, %s30_s19, [#allocation6], %s1014_s28, %s1014_s28, %s1015_s29  }
  0x14   :  { %s1016_s7 = smov [#allocation8]   ;;  %s895_s11 = scalar_lea.hbm %s1158_s3, 2048 }
  0x15   :  { %s53_s8 = sshll.u32 %s1016_s7, 4  ;;  %p896_p8 = scmp.ne.s32.totalorder %s1158_s3, %s895_s11  ;;  %s54_s8 = int_to_ptr.vmem [resolvable:$true] %s53_s8 }
  0x16   :  { %p899_p9 = scmp.lt.u32.totalorder %s895_s11, %s1158_s3 }
  0x18   :  { %p901_p10 = pnand %p899_p9, %p896_p8 }
  0x1a   :  { %904 = shalt.err (!%p901_p10)
}
  0x1b   :  { %s905_s16 = scalar_lea.vmem %s54_s8, 2048  ;;  %p910_p12 = scmp.lt.s32.totalorder %s54_s8, %s54_s8 }
  0x1c   :  { %p906_p11 = scmp.ne.s32.totalorder %s54_s8, %s905_s16  ;;  %p911_p13 = scmp.lt.s32.totalorder %s905_s16, %s905_s16 }
  0x1e   :  { %p912_p0 = por %p911_p13, %p910_p12 }
  0x20   :  { %p913_p1 = pnand %p912_p0, %p906_p11 }
  0x22   :  { %916 = shalt.err (!%p913_p1)
}
  0x23   :  { %s1017_s1 = smov 64   ;;  %s1018_s17 = smov 4  }
  0x24   :  { %59 = dma.hbm_to_vmem [thread:$0]  %s1158_s3, 2048, %s54_s8, [#allocation9], %s1017_s1, %s1017_s1, %s1018_s17  }
  0x25   :  { %s1019_s20 = smov [#allocation2]   ;;  %s1020_s22 = smov [#allocation7]  }
  0x26   :  { %s20_s21 = sshll.u32 %s1019_s20, 4  ;;  %s41_s23 = sshll.u32 %s1020_s22, 4  ;;  %s21_s21 = int_to_ptr.vmem [resolvable:$true] %s20_s21  ;;  %s1081_s23 = int_to_ptr.vmem [resolvable:$true] %s41_s23 }
  0x27   :  { %s917_s26 = scalar_lea.hbm %s1155_s0, 128 }
  0x28   :  { %p918_p2 = scmp.ne.s32.totalorder %s1155_s0, %s917_s26  ;;  %p921_p3 = scmp.lt.u32.totalorder %s917_s26, %s1155_s0 }
  0x2a   :  { %p923_p4 = pnand %p921_p3, %p918_p2 }
  0x2c   :  { %926 = shalt.err (!%p923_p4)
}
  0x2d   :  { %s927_s3 = scalar_lea.vmem %s21_s21, 128  ;;  %p932_p6 = scmp.lt.s32.totalorder %s21_s21, %s21_s21 }
  0x2e   :  { %p928_p5 = scmp.ne.s32.totalorder %s21_s21, %s927_s3  ;;  %p933_p7 = scmp.lt.s32.totalorder %s927_s3, %s927_s3 }
  0x30   :  { %p934_p8 = por %p933_p7, %p932_p6 }
  0x32   :  { %p935_p9 = pnand %p934_p8, %p928_p5 }
  0x34   :  { %938 = shalt.err (!%p935_p9)
}
  0x35   :  { %23 = dma.hbm_to_vmem [thread:$0]  %s1155_s0, 128, %s21_s21, [#allocation3]  }
  0x36   :  { %s939_s12 = scalar_lea.hbm %s1157_s2, 4096 }
  0x37   :  { %p940_p10 = scmp.ne.s32.totalorder %s1157_s2, %s939_s12  ;;  %p943_p11 = scmp.lt.u32.totalorder %s939_s12, %s1157_s2 }
  0x39   :  { %p945_p12 = pnand %p943_p11, %p940_p10 }
  0x3b   :  { %948 = shalt.err (!%p945_p12)
}
  0x3c   :  { %s949_s1 = scalar_lea.vmem %s1081_s23, 4096  ;;  %p954_p0 = scmp.lt.s32.totalorder %s1081_s23, %s1081_s23 }
  0x3d   :  { %p950_p13 = scmp.ne.s32.totalorder %s1081_s23, %s949_s1  ;;  %p955_p1 = scmp.lt.s32.totalorder %s949_s1, %s949_s1 }
  0x3f   :  { %p956_p2 = por %p955_p1, %p954_p0 }
  0x41   :  { %p957_p3 = pnand %p956_p2, %p950_p13 }
  0x43   :  { %960 = shalt.err (!%p957_p3)
}
  0x44   :  { %47 = dma.hbm_to_vmem [thread:$0]  %s1157_s2, 4096, %s1081_s23, [#allocation6], %s1014_s28, %s1014_s28, %s1015_s29  }
  0x45   :  { %s1021_s18 = smov [#allocation10]   ;;  %s961_s22 = scalar_lea.hbm %s1159_s4, 256 }
  0x46   :  { %s66_s19 = sshll.u32 %s1021_s18, 4  ;;  %p962_p4 = scmp.ne.s32.totalorder %s1159_s4, %s961_s22  ;;  %s67_s19 = int_to_ptr.vmem [resolvable:$true] %s66_s19 }
  0x47   :  { %p965_p5 = scmp.lt.u32.totalorder %s961_s22, %s1159_s4 }
  0x49   :  { %p967_p6 = pnand %p965_p5, %p962_p4 }
  0x4b   :  { %970 = shalt.err (!%p967_p6)
}
  0x4c   :  { %s971_s30 = scalar_lea.vmem %s67_s19, 256  ;;  %p976_p8 = scmp.lt.s32.totalorder %s67_s19, %s67_s19 }
  0x4d   :  { %p972_p7 = scmp.ne.s32.totalorder %s67_s19, %s971_s30  ;;  %p977_p9 = scmp.lt.s32.totalorder %s971_s30, %s971_s30 }
  0x4f   :  { %p978_p10 = por %p977_p9, %p976_p8 }
  0x51   :  { %p979_p11 = pnand %p978_p10, %p972_p7 }
  0x53   :  { %982 = shalt.err (!%p979_p11)
}
  0x54   :  { %69 = dma.hbm_to_vmem [thread:$0]  %s1159_s4, 256, %s67_s19, [#allocation9]  }
  0x55   :  { %1005 = dma.done.wait [#allocation3], 128  }
  0x56   :  { %1006 = vsyncadd [#allocation3], 4294967168 }
  0x57   :  { %1007 = dma.done.wait [#allocation6], 4608  }
  0x58   :  { %1008 = vsyncadd [#allocation6], 4294962688 }
  0x59   :  { %1009 = dma.done.wait [#allocation9], 2304  }
  0x5a   :  { %1010 = vsyncadd [#allocation9], 4294964992  ;;  %v1022_v0 = vmov 0   ;;  %v799_v1 = vld [vmem:[#allocation5 + $0x4] ss:$8 sps:$4 sm:$0xff]   ;;  %v98_v5 = vld [vmem:[#allocation2] sm:$0xff]  ;;  %v105_v23 = vlaneseq }
  0x5b   :  { %171 = vmatprep.mubr.bf16.mxu0 %v1022_v0  ;;  %v801_v2 = vld [vmem:[#allocation5] ss:$8 sps:$4 sm:$0xff]   ;;  %139 = vmatprep.subr.bf16.mxu0 %v799_v1  ;;  %v802_v3 = vld [vmem:[#allocation5 + $0x14] ss:$8 sps:$4 sm:$0xff]   ;;  %v804_v4 = vld [vmem:[#allocation5 + $0x10] ss:$8 sps:$4 sm:$0xff]   ;;  %v99_v6 = vpack.c.bf16 %v98_v5, %v98_v5 }
  0x5c   :  { %140 = vmatpush1.bf16.msra.mxu0 %v801_v2  ;;  %vm135_vm0 = vcmask 261120   ;;  %v805_v7 = vld [vmem:[#allocation7 + $0x4] ss:$8 sps:$4 sm:$0xff]   ;;  %v807_v8 = vld [vmem:[#allocation7] ss:$8 sps:$4 sm:$0xff]   ;;  %v106_v24 = vshrl.u32 %v105_v23, 7 }
  0x5d   :  { %141 = vmatprep.subr.bf16.mxu0 %v802_v3  ;;  %v808_v9 = vld [vmem:[#allocation7 + $0x14] ss:$8 sps:$4 sm:$0xff]   ;;  %434 = vmatprep.subr.bf16.mxu1 %v805_v7  ;;  %v810_v10 = vld [vmem:[#allocation7 + $0x10] ss:$8 sps:$4 sm:$0xff]   ;;  %v811_v11 = vld [vmem:[#allocation7 + $0x24] ss:$8 sps:$4 sm:$0xff]  }
  0x5e   :  { %435 = vmatpush1.bf16.msra.mxu1 %v807_v8  ;;  %v813_v12 = vld [vmem:[#allocation7 + $0x20] ss:$8 sps:$4 sm:$0xff]   ;;  %v814_v13 = vld [vmem:[#allocation7 + $0x34] ss:$8 sps:$4 sm:$0xff]   ;;  %v816_v14 = vld [vmem:[#allocation7 + $0x30] ss:$8 sps:$4 sm:$0xff]  }
  0x5f   :  { %436 = vmatprep.subr.bf16.mxu1 %v808_v9  ;;  %v817_v15 = vld [vmem:[#allocation7 + $0x44] ss:$8 sps:$4 sm:$0xff]   ;;  %v819_v16 = vld [vmem:[#allocation7 + $0x40] ss:$8 sps:$4 sm:$0xff]   ;;  %v820_v17 = vld [vmem:[#allocation7 + $0x54] ss:$8 sps:$4 sm:$0xff]  }
  0x60   :  { %142 = vmatpush1.bf16.msra.mxu0 %v804_v4  ;;  %v822_v18 = vld [vmem:[#allocation7 + $0x50] ss:$8 sps:$4 sm:$0xff]   ;;  %v823_v19 = vld [vmem:[#allocation7 + $0x64] ss:$8 sps:$4 sm:$0xff]   ;;  %v825_v20 = vld [vmem:[#allocation7 + $0x60] ss:$8 sps:$4 sm:$0xff]  }
  0x61   :  { %v826_v21 = vld [vmem:[#allocation7 + $0x74] ss:$8 sps:$4 sm:$0xff]   ;;  %v828_v22 = vld [vmem:[#allocation7 + $0x70] ss:$8 sps:$4 sm:$0xff]   ;;  %v1127_v25 = vsub.s32 0, %v106_v24  ;;  %v1129_v27 = vsub.s32 1, %v106_v24 }
  0x62   :  { %437 = vmatpush1.bf16.msra.mxu1 %v810_v10  ;;  %v86_v26 = vld [vmem:[#allocation10] ss:$8 sm:$0x3]  ;;  %v829_v44 = vld [vmem:[#allocation7 + $0x84] ss:$8 sps:$4 sm:$0xff]   ;;  %s1023_s4 = smov [#allocation11]  }
  0x63   :  { %717 = vmatmul.mubr.msk.bf16.vlgmr.msra.gmra.mrb[0].mxu0 %vm135_vm0, %v99_v6  ;;  %438 = vmatprep.subr.bf16.mxu1 %v811_v11  ;;  %v108_v28 = vrot.slane %v86_v26, %v1127_v25  ;;  %v112_v29 = vrot.slane %v86_v26, %v1129_v27  ;;  %v831_v45 = vld [vmem:[#allocation7 + $0x80] ss:$8 sps:$4 sm:$0xff]   ;;  %v832_v46 = vld [vmem:[#allocation7 + $0x94] ss:$8 sps:$4 sm:$0xff]   ;;  %v834_v47 = vld [vmem:[#allocation7 + $0x90] ss:$8 sps:$4 sm:$0xff]  }
  0x64   :  { %v835_v48 = vld [vmem:[#allocation7 + $0xa4] ss:$8 sps:$4 sm:$0xff]   ;;  %v837_v49 = vld [vmem:[#allocation7 + $0xa0] ss:$8 sps:$4 sm:$0xff]   ;;  %v838_v50 = vld [vmem:[#allocation7 + $0xb4] ss:$8 sps:$4 sm:$0xff]  }
  0x65   :  { %v840_v51 = vld [vmem:[#allocation7 + $0xb0] ss:$8 sps:$4 sm:$0xff]   ;;  %v841_v52 = vld [vmem:[#allocation7 + $0xc4] ss:$8 sps:$4 sm:$0xff]   ;;  %v843_v53 = vld [vmem:[#allocation7 + $0xc0] ss:$8 sps:$4 sm:$0xff]  }
  0x66   :  { %439 = vmatpush1.bf16.msra.mxu1 %v813_v12  ;;  %v844_v54 = vld [vmem:[#allocation7 + $0xd4] ss:$8 sps:$4 sm:$0xff]   ;;  %v846_v55 = vld [vmem:[#allocation7 + $0xd0] ss:$8 sps:$4 sm:$0xff]   ;;  %v847_v56 = vld [vmem:[#allocation7 + $0xe4] ss:$8 sps:$4 sm:$0xff]  }
  0x67   :  { %440 = vmatprep.subr.bf16.mxu1 %v814_v13  ;;  %v849_v57 = vld [vmem:[#allocation7 + $0xe0] ss:$8 sps:$4 sm:$0xff]   ;;  %v850_v58 = vld [vmem:[#allocation7 + $0xf4] ss:$8 sps:$4 sm:$0xff]   ;;  %v852_v59 = vld [vmem:[#allocation7 + $0xf0] ss:$8 sps:$4 sm:$0xff]  }
  0x68   :  { %v88_v4 = vld [vmem:[#allocation10 + $0x1] ss:$8 sm:$0x3]  ;;  %v90_v5 = vld [vmem:[#allocation10 + $0x2] ss:$8 sm:$0x3] }
  0x69   :  { %v207_v8 = vrot.slane %v88_v4, %v1127_v25  ;;  %v211_v9 = vrot.slane %v88_v4, %v1129_v27  ;;  %v220_v12 = vrot.slane %v90_v5, %v1127_v25  ;;  %v224_v13 = vrot.slane %v90_v5, %v1129_v27  ;;  %s702_s29 = sshll.u32 %s1023_s4, 4  ;;  %s703_s29 = int_to_ptr.vmem [resolvable:$true] %s702_s29 }
  0x6a   :  { %441 = vmatpush1.bf16.msra.mxu1 %v816_v14  ;;  %s983_s23 = scalar_lea.vmem %s703_s29, 64  ;;  %p988_p13 = scmp.lt.s32.totalorder %s703_s29, %s703_s29 }
  0x6b   :  { %442 = vmatprep.subr.bf16.mxu1 %v817_v15  ;;  %p984_p12 = scmp.ne.s32.totalorder %s703_s29, %s983_s23  ;;  %p989_p0 = scmp.lt.s32.totalorder %s983_s23, %s983_s23 }
  0x6d   :  { %p990_p1 = por %p989_p0, %p988_p13 }
  0x6e   :  { %443 = vmatpush1.bf16.msra.mxu1 %v819_v16 }
  0x6f   :  { %444 = vmatprep.subr.bf16.mxu1 %v820_v17  ;;  %p991_p2 = pnand %p990_p1, %p984_p12 }
  0x72   :  { %445 = vmatpush1.bf16.msra.mxu1 %v822_v18 }
  0x73   :  { %446 = vmatprep.subr.bf16.mxu1 %v823_v19 }
  0x76   :  { %447 = vmatpush1.bf16.msra.mxu1 %v825_v20 }
  0x77   :  { %448 = vmatprep.subr.bf16.mxu1 %v826_v21  ;;  %v92_v21 = vld [vmem:[#allocation10 + $0x3] ss:$8 sm:$0x3] }
  0x78   :  { %v271_v23 = vrot.slane %v92_v21, %v1129_v27 }
  0x7a   :  { %449 = vmatpush1.bf16.msra.mxu1 %v828_v22  ;;  %v267_v22 = vrot.slane %v92_v21, %v1127_v25 }
  0x7b   :  { %450 = vmatprep.subr.bf16.mxu1 %v829_v44  ;;  %v857_v44 = vld [vmem:[#allocation8 + $0x50] sm:$0xff]  }
  0x7e   :  { %451 = vmatpush1.bf16.msra.mxu1 %v831_v45  ;;  %v858_v45 = vld [vmem:[#allocation8 + $0x10] sm:$0xff]  }
  0x7f   :  { %452 = vmatprep.subr.bf16.mxu1 %v832_v46  ;;  %v859_v46 = vld [vmem:[#allocation8 + $0x58] sm:$0xff]  }
  0x82   :  { %453 = vmatpush1.bf16.msra.mxu1 %v834_v47  ;;  %v860_v47 = vld [vmem:[#allocation8 + $0x18] sm:$0xff]  }
  0x83   :  { %454 = vmatprep.subr.bf16.mxu1 %v835_v48  ;;  %v861_v48 = vld [vmem:[#allocation8 + $0x60] sm:$0xff]  }
  0x86   :  { %455 = vmatpush1.bf16.msra.mxu1 %v837_v49  ;;  %v862_v49 = vld [vmem:[#allocation8 + $0x20] sm:$0xff]  }
  0x87   :  { %456 = vmatprep.subr.bf16.mxu1 %v838_v50  ;;  %v863_v50 = vld [vmem:[#allocation8 + $0x68] sm:$0xff]  }
  0x8a   :  { %457 = vmatpush1.bf16.msra.mxu1 %v840_v51  ;;  %v864_v51 = vld [vmem:[#allocation8 + $0x28] sm:$0xff]  }
  0x8b   :  { %458 = vmatprep.subr.bf16.mxu1 %v841_v52  ;;  %v865_v52 = vld [vmem:[#allocation8 + $0x70] sm:$0xff]  }
  0x8e   :  { %459 = vmatpush1.bf16.msra.mxu1 %v843_v53  ;;  %v866_v53 = vld [vmem:[#allocation8 + $0x30] sm:$0xff]  }
  0x8f   :  { %460 = vmatprep.subr.bf16.mxu1 %v844_v54  ;;  %v867_v54 = vld [vmem:[#allocation8 + $0x78] sm:$0xff]  }
  0x92   :  { %461 = vmatpush1.bf16.msra.mxu1 %v846_v55  ;;  %v868_v55 = vld [vmem:[#allocation8 + $0x38] sm:$0xff]  }
  0x93   :  { %462 = vmatprep.subr.bf16.mxu1 %v847_v56 }
  0x96   :  { %463 = vmatpush1.bf16.msra.mxu1 %v849_v57 }
  0x97   :  { %464 = vmatprep.subr.bf16.mxu1 %v850_v58 }
  0x9a   :  { %465 = vmatpush1.bf16.msra.mxu1 %v852_v59 }
 0x136   :  { %v173_v30 = vpop.f32.mrb[0].mxu0 }
 0x137   :  { %v174_v31 = vadd.f32 %v173_v30, %v108_v28  ;;  %v175_v32 = vpop.f32.mrb[1].mxu0 }
 0x138   :  { %v176_v33 = vadd.f32 %v175_v32, %v112_v29  ;;  %v177_v34 = vpop.f32.mrb[2].mxu0 }
 0x139   :  { %v180_v35 = vmul.f32 0.01, %v174_v31  ;;  %v178_v36 = vpop.f32.mrb[3].mxu0 }
 0x13a   :  { %v181_v37 = vmul.f32 0.01, %v176_v33 }
 0x13b   :  { %v182_v38 = vmax.f32 %v174_v31, %v180_v35 }
 0x13c   :  { %v183_v39 = vmax.f32 %v176_v33, %v181_v37 }
 0x13d   :  { %v187_v41 = vmul.f32 %v182_v38, %v182_v38 }
 0x13e   :  { %v184_v40 = vadd.f32 %v183_v39, %v182_v38  ;;  %v188_v42 = vmul.f32 %v183_v39, %v183_v39 }
 0x140   :  { %185 = vadd.xlane.f32.xlu0 %v184_v40  ;;  %v189_v43 = vadd.f32 %v188_v42, %v187_v41  ;;  %v853_v40 = vld [vmem:[#allocation8 + $0x40] sm:$0xff]   ;;  %v855_v42 = vld [vmem:[#allocation8 + $0x48] sm:$0xff]  }
 0x141   :  { %v854_v41 = vld [vmem:[#allocation8] sm:$0xff]   ;;  %766 = vmatprep.subr.bf16.mxu0 %v853_v40 }
 0x142   :  { %767 = vmatpush3.bf16.msra.mxu0 %v854_v41 }
 0x143   :  { %768 = vmatprep.subr.bf16.mxu0 %v855_v42 }
 0x144   :  { %190 = vadd.xlane.f32.xlu0 %v189_v43  ;;  %v856_v43 = vld [vmem:[#allocation8 + $0x8] sm:$0xff]  }
 0x146   :  { %769 = vmatpush3.bf16.msra.mxu0 %v856_v43 }
 0x147   :  { %770 = vmatprep.subr.bf16.mxu0 %v857_v44 }
 0x14a   :  { %771 = vmatpush3.bf16.msra.mxu0 %v858_v45 }
 0x14b   :  { %772 = vmatprep.subr.bf16.mxu0 %v859_v46 }
 0x14e   :  { %773 = vmatpush3.bf16.msra.mxu0 %v860_v47 }
 0x14f   :  { %774 = vmatprep.subr.bf16.mxu0 %v861_v48 }
 0x152   :  { %775 = vmatpush3.bf16.msra.mxu0 %v862_v49 }
 0x153   :  { %776 = vmatprep.subr.bf16.mxu0 %v863_v50 }
 0x156   :  { %777 = vmatpush3.bf16.msra.mxu0 %v864_v51 }
 0x157   :  { %778 = vmatprep.subr.bf16.mxu0 %v865_v52 }
 0x15a   :  { %779 = vmatpush3.bf16.msra.mxu0 %v866_v53 }
 0x15b   :  { %780 = vmatprep.subr.bf16.mxu0 %v867_v54 }
 0x15e   :  { %781 = vmatpush3.bf16.msra.mxu0 %v868_v55 }
 0x1cd   :  { %v186_v60 = vpop.xlane.xlu0 %185 }
 0x1ce   :  { %v192_v61 = vmul.f32 0.005, %v186_v60 }
 0x1d0   :  { %v194_v63 = vmul.f32 %v192_v61, %v192_v61  ;;  %v197_v6 = vsub.f32 %v182_v38, %v192_v61  ;;  %v198_v7 = vsub.f32 %v183_v39, %v192_v61 }
 0x1d1   :  { %v191_v62 = vpop.xlane.xlu0 %190 }
 0x1d2   :  { %v193_v0 = vmul.f32 0.005, %v191_v62 }
 0x1d4   :  { %v195_v1 = vsub.f32 %v193_v0, %v194_v63  ;;  %v94_v0 = vld [vmem:[#allocation10 + $0x4] ss:$8 sm:$0x3] }
 0x1d5   :  { %v502_v4 = vrot.slane %v94_v0, %v1127_v25  ;;  %v506_v5 = vrot.slane %v94_v0, %v1129_v27 }
 0x1d6   :  { %v196_v2 = vmax.f32 %v195_v1, 0.0  ;;  %v96_v1 = vld [vmem:[#allocation10 + $0x5] ss:$8 sm:$0x3] }
 0x1d8   :  { %v199_v3 = vadd.f32 1e-05, %v196_v2 }
 0x1da   :  { %869 = vrsqrt.f32 %v199_v3 }
 0x1e4   :  { %v870_v10 = vpop.eup %869 }
 0x1e5   :  { %v202_v11 = vmul.f32 %v870_v10, %v198_v7  ;;  %v201_v14 = vmul.f32 %v870_v10, %v197_v6 }
 0x1e7   :  { %v215_v15 = vmul.f32 %v211_v9, %v202_v11  ;;  %v214_v16 = vmul.f32 %v207_v8, %v201_v14  ;;  %v515_v8 = vrot.slane %v96_v1, %v1127_v25  ;;  %v519_v9 = vrot.slane %v96_v1, %v1129_v27 }
 0x1e9   :  { %v228_v17 = vadd.f32 %v224_v13, %v215_v15  ;;  %v227_v18 = vadd.f32 %v220_v12, %v214_v16 }
 0x1eb   :  { %v230_v19 = vpack.c.bf16 %v228_v17, %v228_v17  ;;  %v229_v20 = vpack.c.bf16 %v227_v18, %v227_v18  ;;  %v97_v18 = vld [vmem:[#allocation10 + $0x6] ss:$0 sm:$0xff] }
 0x1ed   :  { %466 = vmatprep.mubr.bf16.mxu1 %v230_v19 }
 0x1ee   :  { %467 = vmatmul.mubr.bf16.vlgmr.msra.gmra.mrb[0].mxu1 %v229_v20 }
 0x2c1   :  { %v468_v24 = vpop.f32.mrb[0].mxu1 }
 0x2c2   :  { %v469_v26 = vadd.f32 %v468_v24, %v267_v22  ;;  %v470_v28 = vpop.f32.mrb[1].mxu1 }
 0x2c3   :  { %v471_v29 = vadd.f32 %v470_v28, %v271_v23  ;;  %v472_v30 = vpop.f32.mrb[2].mxu1 }
 0x2c4   :  { %v475_v31 = vmul.f32 0.01, %v469_v26  ;;  %v473_v32 = vpop.f32.mrb[3].mxu1 }
 0x2c5   :  { %v476_v33 = vmul.f32 0.01, %v471_v29 }
 0x2c6   :  { %v477_v34 = vmax.f32 %v469_v26, %v475_v31 }
 0x2c7   :  { %v478_v35 = vmax.f32 %v471_v29, %v476_v33 }
 0x2c8   :  { %v482_v37 = vmul.f32 %v477_v34, %v477_v34 }
 0x2c9   :  { %v479_v36 = vadd.f32 %v478_v35, %v477_v34  ;;  %v483_v38 = vmul.f32 %v478_v35, %v478_v35 }
 0x2cb   :  { %480 = vadd.xlane.f32.xlu1 %v479_v36  ;;  %v484_v39 = vadd.f32 %v483_v38, %v482_v37 }
 0x2cf   :  { %485 = vadd.xlane.f32.xlu1 %v484_v39 }
 0x358   :  { %v481_v56 = vpop.xlane.xlu1 %480 }
 0x359   :  { %v487_v57 = vmul.f32 0.005, %v481_v56 }
 0x35b   :  { %v489_v59 = vmul.f32 %v487_v57, %v487_v57  ;;  %v492_v2 = vsub.f32 %v477_v34, %v487_v57  ;;  %v493_v3 = vsub.f32 %v478_v35, %v487_v57 }
 0x35c   :  { %v486_v58 = vpop.xlane.xlu1 %485 }
 0x35d   :  { %v488_v60 = vmul.f32 0.005, %v486_v58 }
 0x35f   :  { %v490_v61 = vsub.f32 %v488_v60, %v489_v59 }
 0x361   :  { %v491_v62 = vmax.f32 %v490_v61, 0.0 }
 0x363   :  { %v494_v63 = vadd.f32 1e-05, %v491_v62 }
 0x365   :  { %871 = vrsqrt.f32 %v494_v63 }
 0x36f   :  { %v872_v6 = vpop.eup %871 }
 0x370   :  { %v497_v7 = vmul.f32 %v872_v6, %v493_v3  ;;  %v496_v10 = vmul.f32 %v872_v6, %v492_v2 }
 0x372   :  { %v510_v11 = vmul.f32 %v506_v5, %v497_v7  ;;  %v509_v12 = vmul.f32 %v502_v4, %v496_v10 }
 0x374   :  { %v523_v13 = vadd.f32 %v519_v9, %v510_v11  ;;  %v522_v14 = vadd.f32 %v515_v8, %v509_v12 }
 0x376   :  { %v525_v15 = vpack.c.bf16 %v523_v13, %v523_v13  ;;  %v524_v16 = vpack.c.bf16 %v522_v14, %v522_v14 }
 0x378   :  { %686 = vmatprep.mubr.bf16.mxu0 %v525_v15 }
 0x379   :  { %687 = vmatmul.mubr.bf16.vlgmr.msra.gmra.mrb[4].mxu0 %v524_v16 }
 0x44c   :  { %v782_v17 = vpop.f32.mrb[4].mxu0 }
 0x44d   :  { %v783_v19 = vpop.f32.mrb[5].mxu0 }
 0x44e   :  { %v784_v20 = vadd.f32 %v783_v19, %v782_v17  ;;  %v785_v21 = vpop.f32.mrb[6].mxu0 }
 0x44f   :  { %v786_v22 = vpop.f32.mrb[7].mxu0 }
 0x450   :  { %v689_v25 = vadd.f32 %v784_v20, %v97_v18 }
 0x452   :  { %v694_v23 = vpack.c.bf16 %v689_v25, %v689_v25 }
 0x454   :  { %695 = vst [vmem:[#allocation11] sm:$0xf] %v694_v23 }
 0x455   :  { %994 = shalt.err (!%p991_p2)
}
 0x456   :  { %s995_s3 = scalar_lea.hbm %s1160_s5, 64 }
 0x457   :  { %p996_p3 = scmp.ne.s32.totalorder %s1160_s5, %s995_s3  ;;  %p999_p4 = scmp.lt.u32.totalorder %s995_s3, %s1160_s5 }
 0x459   :  { %p1001_p5 = pnand %p999_p4, %p996_p3 }
 0x45b   :  { %1004 = shalt.err (!%p1001_p5)
}
 0x45c   :  { %705 = dma.vmem_to_hbm [thread:$0]  %s703_s29, 64, %s1160_s5, [#allocation4]  }
 0x45d   :  { %1011 = dma.done.wait [#allocation4], 64  }
 0x45e   :  { %1012 = vsyncadd [#allocation4], 4294967232 }
 0x45f   :  { %709 = vsyncpa [#allocation3], 1 }
 0x460   :  { %710 = vsyncpa [#allocation6], 1 }
 0x461   :  { %711 = vsyncpa [#allocation9], 1 }
 0x462   :  { %712 = vsyncpa [#allocation4], 1 }

</bundles_post_ra>
